<compile_context>
chip_gen: v6e
topology: v6e:2x2x1
jax: 0.10.0
libtpu: 0.0.40
codegen_flags: <defaults>
</compile_context>

<pallas_src>
import jax
import jax.numpy as jnp
from jax.experimental import pallas as pl
from jax.experimental.pallas import tpu as pltpu


def _round_up(x, m):
    return ((x + m - 1) // m) * m


def _vmem_capacity_bytes():
    try:
        info = pltpu.get_tpu_info()
        cap = getattr(info, "vmem_capacity_bytes", None)
        if cap:
            return int(cap)
    except Exception:
        pass
    return 64 << 20  # conservative (v7x-sized) default


def _gen_policy():
    """Per-generation VMEM budget / tile ladder / minimum grid steps."""
    cap = _vmem_capacity_bytes()
    if cap >= (100 << 20):  # v5e / v6e: 128 MiB physical VMEM
        return dict(budget=48 << 20, limit=64 << 20,
                    ladder=(4096, 2048, 1024, 512, 256, 128, 64, 32, 16),
                    min_steps=4)
    # v7x-sized (64 MiB physical): conservative budget, >= 4 steps per TensorCore.
    return dict(budget=22 << 20, limit=32 << 20,
                ladder=(1024, 512, 256, 128, 64, 32, 16),
                min_steps=8)


# -----------------------------------------------------------------------------
# Fused kernel: patch extraction + projection in one pallas_call.
# -----------------------------------------------------------------------------
def fused_patch_embed(x, w_flat, bias_row, *, t_patch_size, patch_hw, out_dtype):
    """x: (B, C, T, H, W) f32 -> (B, Tg, Hg*Wg, E).  w_flat: (K, E) bf16."""
    B, C, T, H, W = x.shape
    tp = t_patch_size
    ph, pw = patch_hw
    Tg, Hg, Wg = T // tp, H // ph, W // pw
    K, E = w_flat.shape
    M = Hg * Wg

    # Pure row-major split reshape: no data movement in HBM.
    xr = x.reshape(B, C, Tg, tp, Hg, ph, Wg, pw)

    def kernel(x_ref, w_ref, b_ref, o_ref):
        xt = x_ref[...]                               # (C, tp, Hg, ph, Wg, pw) f32
        # Patch relayout in VMEM (the minor dim pw is preserved by the transpose).
        xt = jnp.transpose(xt, (2, 4, 0, 1, 3, 5))    # (Hg, Wg, C, tp, ph, pw)
        p = xt.reshape(M, K).astype(jnp.bfloat16)     # rows=(hg,wg), lanes=(c,kt,kh,kw)
        acc = jnp.dot(p, w_ref[...], preferred_element_type=jnp.float32)
        o_ref[...] = (acc + b_ref[...]).astype(o_ref.dtype)

    pol = _gen_policy()
    itemsize = jnp.dtype(x.dtype).itemsize
    out_itemsize = jnp.dtype(out_dtype).itemsize
    # VMEM need (trailing dims are padded to (8, 128) tiles in VMEM).
    x_blk = C * tp * Hg * ph * _round_up(Wg, 8) * _round_up(pw, 128) * itemsize
    w_blk = _round_up(K, 8) * _round_up(E, 128) * 2
    o_blk = _round_up(M, 8) * _round_up(E, 128) * out_itemsize
    need = 2 * x_blk + 2 * w_blk + 2 * o_blk + (8 << 20)  # + relayout temporaries
    vmem_limit = max(pol["limit"], need)

    cost = pl.CostEstimate(
        flops=2 * B * Tg * M * K * E,
        transcendentals=0,
        bytes_accessed=B * C * T * H * W * itemsize + K * E * 2
        + B * Tg * M * E * out_itemsize,
    )

    return pl.pallas_call(
        kernel,
        out_shape=jax.ShapeDtypeStruct((B, Tg, M, E), out_dtype),
        grid_spec=pltpu.PrefetchScalarGridSpec(
            num_scalar_prefetch=0,
            grid=(B, Tg),
            in_specs=[
                pl.BlockSpec((None, C, None, tp, Hg, ph, Wg, pw),
                             lambda b, t: (b, 0, t, 0, 0, 0, 0, 0)),
                # Resident weight / bias (constant index maps across the grid).
                pl.BlockSpec((K, E), lambda b, t: (0, 0)),
                pl.BlockSpec((1, E), lambda b, t: (0, 0)),
            ],
            out_specs=pl.BlockSpec((None, None, M, E), lambda b, t: (b, t, 0, 0)),
        ),
        compiler_params=pltpu.CompilerParams(
            dimension_semantics=("parallel", "parallel"),
            vmem_limit_bytes=vmem_limit,
        ),
        cost_estimate=cost,
    )(xr, w_flat, bias_row)


# -----------------------------------------------------------------------------
# Unfused fallback: wrapper-side patch extraction + row-tiled matmul kernel.
# -----------------------------------------------------------------------------
def _patch_proj_kernel(p_ref, w_ref, b_ref, o_ref):
    # p_ref: (tm, K) bf16 | w_ref: (K, E) bf16 | b_ref: (1, E) f32 | o_ref: (tm, E)
    acc = jnp.dot(p_ref[...], w_ref[...], preferred_element_type=jnp.float32)
    o_ref[...] = (acc + b_ref[...]).astype(o_ref.dtype)


def _pick_row_tile(n_rows, k, e, in_bytes, out_bytes, *, ladder, budget, min_steps):
    """Largest row tile whose double-buffered working set fits the VMEM budget.

    Prefers tiles >= 256 that divide n_rows exactly (avoids a separate zero-pad
    pass over the patch matrix) and keeps >= min_steps grid steps for large
    n_rows so the pipeline / both v7x TensorCores stay busy.
    """
    e_lanes = _round_up(e, 128)
    resident = 2 * k * e_lanes * in_bytes + 2 * e_lanes * 4   # weight + bias buffers
    row_cap = max(16, _round_up(n_rows, 16))
    if n_rows >= min_steps * 128:
        row_cap = max(16, _round_up(-(-n_rows // min_steps), 16))
    best = None
    for tm in ladder:
        if tm > row_cap:
            continue
        per_tile = 2 * tm * k * in_bytes + 2 * tm * e_lanes * out_bytes
        if resident + per_tile > budget:
            continue
        if best is None:
            best = tm                      # largest tile that fits the budget
        if tm >= 256 and n_rows % tm == 0:
            return tm                      # large AND divides N: take it
    return best if best is not None else 16


def patch_proj_matmul(patches, w_flat, bias_row, *, out_dtype):
    """patches: (N, K) bf16, w_flat: (K, E) bf16, bias_row: (1, E) f32 -> (N, E)."""
    N, K = patches.shape
    Kw, E = w_flat.shape
    assert Kw == K

    in_bytes = jnp.dtype(patches.dtype).itemsize
    out_bytes = jnp.dtype(out_dtype).itemsize

    # Keep the contraction dim lane-aligned (no-op for the default K = 1024).
    K_pad = _round_up(K, 128)
    if K_pad != K:
        patches = jnp.pad(patches, ((0, 0), (0, K_pad - K)))
        w_flat = jnp.pad(w_flat, ((0, K_pad - K), (0, 0)))

    pol = _gen_policy()
    tm = _pick_row_tile(N, K_pad, E, in_bytes, out_bytes,
                        ladder=pol["ladder"], budget=pol["budget"],
                        min_steps=pol["min_steps"])
    N_pad = _round_up(N, tm)
    if N_pad != N:
        patches = jnp.pad(patches, ((0, N_pad - N), (0, 0)))

    e_lanes = _round_up(E, 128)
    working = (2 * K_pad * e_lanes * in_bytes + 2 * e_lanes * 4
               + 2 * tm * K_pad * in_bytes + 2 * tm * e_lanes * out_bytes)
    vmem_limit = max(pol["limit"], working + (2 << 20))

    cost = pl.CostEstimate(
        flops=2 * N_pad * K_pad * E,
        transcendentals=0,
        bytes_accessed=(N_pad * K_pad + K_pad * E) * in_bytes
        + N_pad * E * out_bytes + E * 4,
    )

    out = pl.pallas_call(
        _patch_proj_kernel,
        out_shape=jax.ShapeDtypeStruct((N_pad, E), out_dtype),
        grid_spec=pltpu.PrefetchScalarGridSpec(
            num_scalar_prefetch=0,
            grid=(N_pad // tm,),
            in_specs=[
                pl.BlockSpec((tm, K_pad), lambda i: (i, 0)),
                pl.BlockSpec((K_pad, E), lambda i: (0, 0)),
                pl.BlockSpec((1, E), lambda i: (0, 0)),
            ],
            out_specs=pl.BlockSpec((tm, E), lambda i: (i, 0)),
        ),
        compiler_params=pltpu.CompilerParams(
            dimension_semantics=("parallel",),
            vmem_limit_bytes=vmem_limit,
        ),
        cost_estimate=cost,
    )(patches, w_flat, bias_row)
    return out[:N, :]


# -----------------------------------------------------------------------------
# Module wrapper.
# -----------------------------------------------------------------------------
class PatchEmbedPallas:
    """JAX/Pallas equivalent of the PyTorch PatchEmbed module (forward only)."""

    def __init__(self, img_size=16, patch_size=8, in_chans=4, embed_dim=32,
                 frames=8, t_patch_size=4, key=None):
        img_size = (img_size, img_size)
        patch_size = (patch_size, patch_size)
        assert img_size[1] % patch_size[1] == 0
        assert img_size[0] % patch_size[0] == 0
        assert frames % t_patch_size == 0
        self.img_size = img_size
        self.patch_size = patch_size
        self.frames = frames
        self.t_patch_size = t_patch_size
        self.in_chans = in_chans
        self.embed_dim = embed_dim
        self.grid_size = img_size[0] // patch_size[0]
        self.t_grid_size = frames // t_patch_size
        self.input_size = (self.t_grid_size,
                           img_size[0] // patch_size[0],
                           img_size[1] // patch_size[1])
        self.num_patches = (img_size[1] // patch_size[1]) * \
                           (img_size[0] // patch_size[0]) * self.t_grid_size

        # Deterministic parameter init (synthetic; shapes match nn.Conv3d).
        key = jax.random.PRNGKey(0) if key is None else key
        kw, kb = jax.random.split(key)
        K = in_chans * t_patch_size * patch_size[0] * patch_size[1]
        self.K = K
        bound = 1.0 / (K ** 0.5)
        # PyTorch Conv3d weight shape: (embed_dim, in_chans, tp, ph, pw)
        self.weight = jax.random.uniform(
            kw, (embed_dim, in_chans, t_patch_size, patch_size[0], patch_size[1]),
            dtype=jnp.float32, minval=-bound, maxval=bound)
        self.bias = jax.random.uniform(
            kb, (embed_dim,), dtype=jnp.float32, minval=-bound, maxval=bound)

        # Kernel-ready parameters, computed once.  Rows of w_flat are ordered
        # (c, kt, kh, kw) == PyTorch Conv3d's reduction order.
        self.w_flat = jnp.asarray(self.weight.reshape(embed_dim, K).T,
                                  dtype=jnp.bfloat16)               # (K, E) bf16
        self.bias_row = self.bias.astype(jnp.float32).reshape(1, embed_dim)

    def __call__(self, x, impl="fused"):
        # x: (B, C, T, H, W) -- same layout as PyTorch.
        B, C, T, H, W = x.shape
        assert H == self.img_size[0] and W == self.img_size[1]
        assert T == self.frames and C == self.in_chans
        tp = self.t_patch_size
        ph, pw = self.patch_size
        Tg, Hg, Wg = T // tp, H // ph, W // pw
        E = self.embed_dim

        if impl == "fused":
            # One kernel: patch extraction (VMEM relayout) + projection.
            return fused_patch_embed(
                x, self.w_flat, self.bias_row,
                t_patch_size=tp, patch_hw=(ph, pw), out_dtype=x.dtype)

        # Unfused fallback: materialize the patch matrix wrapper-side in bf16
        # (one extra half-width HBM round trip) and run the tiled matmul.
        xc = x.astype(jnp.bfloat16)
        xr = xc.reshape(B, C, Tg, tp, Hg, ph, Wg, pw)
        xr = jnp.transpose(xr, (0, 2, 4, 6, 1, 3, 5, 7))   # (B,Tg,Hg,Wg,C,tp,ph,pw)
        patches = xr.reshape(B * Tg * Hg * Wg, self.K)
        out_flat = patch_proj_matmul(patches, self.w_flat, self.bias_row,
                                     out_dtype=x.dtype)
        # (B, Tg, Hg*Wg, E) == torch.einsum('ncts->ntsc', conv(x).flatten(3))
        return out_flat.reshape(B, Tg, Hg * Wg, E)


def _reference(x, weight, bias, tp, ph, pw):
    """Pure-JAX reference: Conv3d with stride == kernel, NCTHW layout."""
    y = jax.lax.conv_general_dilated(
        x, weight, window_strides=(tp, ph, pw), padding="VALID",
        dimension_numbers=("NCTHW", "OITHW", "NCTHW"))
    y = y + bias[None, :, None, None, None]
    B, E, Tg, Hg, Wg = y.shape
    return jnp.einsum("ncts->ntsc", y.reshape(B, E, Tg, Hg * Wg))


if __name__ == "__main__":
    key = jax.random.PRNGKey(0)
    kx, kp = jax.random.split(key)
    B, C, T, H, W = 2, 4, 8, 16, 16
    x = jax.random.normal(kx, (B, C, T, H, W), dtype=jnp.float32)

    mod = PatchEmbedPallas(img_size=16, patch_size=8, in_chans=C,
                           embed_dim=32, frames=T, t_patch_size=4, key=kp)

    # References: the kernels feed the MXU bf16 operands with f32 accumulation,
    # so the tight check rounds inputs/weights to bf16 first.
    xb = x.astype(jnp.bfloat16).astype(jnp.float32)
    wb = mod.weight.astype(jnp.bfloat16).astype(jnp.float32)
    ref_bf16 = _reference(xb, wb, mod.bias, mod.t_patch_size,
                          mod.patch_size[0], mod.patch_size[1])
    ref_f32 = _reference(x, mod.weight, mod.bias, mod.t_patch_size,
                         mod.patch_size[0], mod.patch_size[1])

    def _matches(o):
        return (o.shape == ref_bf16.shape and
                bool(jnp.allclose(o, ref_bf16, atol=2e-3, rtol=2e-3)))

    # Primary: fused kernel.  If the in-VMEM patch relayout fails to lower (or
    # miscompares) on this Mosaic version, fall back to the unfused kernel.
    out = None
    try:
        cand = jax.block_until_ready(jax.jit(lambda v: mod(v, impl="fused"))(x))
        if _matches(cand):
            out = cand
    except Exception:
        out = None
    if out is None:
        out = jax.block_until_ready(jax.jit(lambda v: mod(v, impl="unfused"))(x))

    assert out.shape == (B, mod.t_grid_size,
                         mod.grid_size * mod.grid_size, mod.embed_dim)
    assert jnp.allclose(out, ref_bf16, atol=2e-3, rtol=2e-3), \
        "mismatch vs bf16-rounded reference"
    assert jnp.allclose(out, ref_f32, atol=5e-2, rtol=5e-2), \
        "mismatch vs f32 reference"
    print("KERNEL_OK")
</pallas_src>

<mosaic_0001>
module attributes {stable_mosaic.version = 11 : i64} {
  func.func @kernel(%arg0: i32, %arg1: i32, %arg2: memref<1x4x1x4x2x8x2x8xf32, #tpu.memory_space<vmem>>, %arg3: memref<1024x32xbf16, #tpu.memory_space<vmem>>, %arg4: memref<1x32xf32, #tpu.memory_space<vmem>>, %arg5: memref<1x1x4x32xf32, #tpu.memory_space<vmem>>) attributes {dimension_semantics = [#tpu.dimension_semantics<parallel>, #tpu.dimension_semantics<parallel>], iteration_bounds = array<i64: 2, 2>, scalar_prefetch = 0 : i64, scratch_operands = 0 : i64, tpu.core_type = #tpu.core_type<tc>, window_params = [{transform_indices = @transform_0, window_bounds = array<i64: 1, 4, 1, 4, 2, 8, 2, 8>}, {pipeline_mode = #tpu.pipeline_mode<synchronous>, transform_indices = @transform_1, window_bounds = array<i64: 1024, 32>}, {pipeline_mode = #tpu.pipeline_mode<synchronous>, transform_indices = @transform_2, window_bounds = array<i64: 1, 32>}, {transform_indices = @transform_3, window_bounds = array<i64: 1, 1, 4, 32>}]} {
    %c0 = arith.constant 0 : index
    %c0_0 = arith.constant 0 : index
    %c0_1 = arith.constant 0 : index
    %c0_2 = arith.constant 0 : index
    %c0_3 = arith.constant 0 : index
    %c0_4 = arith.constant 0 : index
    %c0_5 = arith.constant 0 : index
    %c0_6 = arith.constant 0 : index
    %0 = vector.load %arg2[%c0, %c0_0, %c0_1, %c0_2, %c0_3, %c0_4, %c0_5, %c0_6] : memref<1x4x1x4x2x8x2x8xf32, #tpu.memory_space<vmem>>, vector<1x4x1x4x2x8x2x8xf32>
    %1 = vector.shape_cast %0 : vector<1x4x1x4x2x8x2x8xf32> to vector<4x4x2x8x2x8xf32>
    %2 = tpu.transpose %1, [2, 4, 0, 1, 3, 5] : vector<4x4x2x8x2x8xf32> -> vector<2x2x4x4x8x8xf32>
    %3 = vector.shape_cast %2 : vector<2x2x4x4x8x8xf32> to vector<4x1024xf32>
    %4 = arith.truncf %3 : vector<4x1024xf32> to vector<4x1024xbf16>
    %c0_7 = arith.constant 0 : index
    %c0_8 = arith.constant 0 : index
    %5 = vector.load %arg3[%c0_7, %c0_8] : memref<1024x32xbf16, #tpu.memory_space<vmem>>, vector<1024x32xbf16>
    %cst = arith.constant dense<0.000000e+00> : vector<4x32xf32>
    %6 = tpu.matmul %4, %5, %cst {dimension_numbers = #tpu.dot_dimension_numbers<[1], [0], [0], [1], [0, 0, 1, 1], [], []>} : vector<4x1024xbf16>, vector<1024x32xbf16>, vector<4x32xf32> -> vector<4x32xf32>
    %c0_9 = arith.constant 0 : index
    %c0_10 = arith.constant 0 : index
    %7 = vector.load %arg4[%c0_9, %c0_10] : memref<1x32xf32, #tpu.memory_space<vmem>>, vector<1x32xf32>
    %8 = vector.broadcast %7 : vector<1x32xf32> to vector<4x32xf32>
    %9 = arith.addf %6, %8 : vector<4x32xf32>
    %c0_11 = arith.constant 0 : index
    %c0_12 = arith.constant 0 : index
    %c0_13 = arith.constant 0 : index
    %c0_14 = arith.constant 0 : index
    %10 = vector.load %arg5[%c0_11, %c0_12, %c0_13, %c0_14] : memref<1x1x4x32xf32, #tpu.memory_space<vmem>>, vector<1x1x4x32xf32>
    %11 = vector.shape_cast %10 : vector<1x1x4x32xf32> to vector<4x32xf32>
    %12 = vector.shape_cast %9 : vector<4x32xf32> to vector<1x1x4x32xf32>
    tpu.vector_store %arg5[%c0_11, %c0_12, %c0_13, %c0_14], %12 {strides = array<i32>} : memref<1x1x4x32xf32, #tpu.memory_space<vmem>>, vector<1x1x4x32xf32>,
    return
  }
  func.func @transform_0(%arg0: i32, %arg1: i32) -> (i32, i32, i32, i32, i32, i32, i32, i32) {
    %c0_i32 = arith.constant 0 : i32
    %c0_i32_0 = arith.constant 0 : i32
    %c0_i32_1 = arith.constant 0 : i32
    %c0_i32_2 = arith.constant 0 : i32
    %c0_i32_3 = arith.constant 0 : i32
    %c0_i32_4 = arith.constant 0 : i32
    %c0_i32_5 = arith.constant 0 : i32
    return %arg0, %c0_i32, %arg1, %c0_i32_0, %c0_i32_1, %c0_i32_2, %c0_i32_3, %c0_i32_4 : i32, i32, i32, i32, i32, i32, i32, i32
  }
  func.func @transform_1(%arg0: i32, %arg1: i32) -> (i32, i32) {
    %c0_i32 = arith.constant 0 : i32
    %c0_i32_0 = arith.constant 0 : i32
    %c0_i32_1 = arith.constant 0 : i32
    return %c0_i32, %c0_i32_0 : i32, i32
  }
  func.func @transform_2(%arg0: i32, %arg1: i32) -> (i32, i32) {
    %c0_i32 = arith.constant 0 : i32
    %c0_i32_0 = arith.constant 0 : i32
    %c0_i32_1 = arith.constant 0 : i32
    return %c0_i32, %c0_i32_0 : i32, i32
  }
  func.func @transform_3(%arg0: i32, %arg1: i32) -> (i32, i32, i32, i32) {
    %c0_i32 = arith.constant 0 : i32
    %c0_i32_0 = arith.constant 0 : i32
    %c0_i32_1 = arith.constant 0 : i32
    return %arg0, %arg1, %c0_i32, %c0_i32_0 : i32, i32, i32, i32
  }
}

module attributes {stable_mosaic.version = 11 : i64} {
  func.func @_patch_proj_kernel(%arg0: i32, %arg1: memref<16x1024xbf16, #tpu.memory_space<vmem>>, %arg2: memref<1024x32xbf16, #tpu.memory_space<vmem>>, %arg3: memref<1x32xf32, #tpu.memory_space<vmem>>, %arg4: memref<16x32xf32, #tpu.memory_space<vmem>>) attributes {dimension_semantics = [#tpu.dimension_semantics<parallel>], iteration_bounds = array<i64: 1>, scalar_prefetch = 0 : i64, scratch_operands = 0 : i64, tpu.core_type = #tpu.core_type<tc>, window_params = [{transform_indices = @transform_0, window_bounds = array<i64: 16, 1024>}, {pipeline_mode = #tpu.pipeline_mode<synchronous>, transform_indices = @transform_1, window_bounds = array<i64: 1024, 32>}, {pipeline_mode = #tpu.pipeline_mode<synchronous>, transform_indices = @transform_2, window_bounds = array<i64: 1, 32>}, {transform_indices = @transform_3, window_bounds = array<i64: 16, 32>}]} {
    %c0 = arith.constant 0 : index
    %c0_0 = arith.constant 0 : index
    %0 = vector.load %arg1[%c0, %c0_0] : memref<16x1024xbf16, #tpu.memory_space<vmem>>, vector<16x1024xbf16>
    %c0_1 = arith.constant 0 : index
    %c0_2 = arith.constant 0 : index
    %1 = vector.load %arg2[%c0_1, %c0_2] : memref<1024x32xbf16, #tpu.memory_space<vmem>>, vector<1024x32xbf16>
    %cst = arith.constant dense<0.000000e+00> : vector<16x32xf32>
    %2 = tpu.matmul %0, %1, %cst {dimension_numbers = #tpu.dot_dimension_numbers<[1], [0], [0], [1], [0, 0, 1, 1], [], []>} : vector<16x1024xbf16>, vector<1024x32xbf16>, vector<16x32xf32> -> vector<16x32xf32>
    %c0_3 = arith.constant 0 : index
    %c0_4 = arith.constant 0 : index
    %3 = vector.load %arg3[%c0_3, %c0_4] : memref<1x32xf32, #tpu.memory_space<vmem>>, vector<1x32xf32>
    %4 = vector.broadcast %3 : vector<1x32xf32> to vector<16x32xf32>
    %5 = arith.addf %2, %4 : vector<16x32xf32>
    %c0_5 = arith.constant 0 : index
    %c0_6 = arith.constant 0 : index
    %6 = vector.load %arg4[%c0_5, %c0_6] : memref<16x32xf32, #tpu.memory_space<vmem>>, vector<16x32xf32>
    tpu.vector_store %arg4[%c0_5, %c0_6], %5 {strides = array<i32>} : memref<16x32xf32, #tpu.memory_space<vmem>>, vector<16x32xf32>,
    return
  }
  func.func @transform_0(%arg0: i32) -> (i32, i32) {
    %c0_i32 = arith.constant 0 : i32
    %c0_i32_0 = arith.constant 0 : i32
    return %arg0, %c0_i32 : i32, i32
  }
  func.func @transform_1(%arg0: i32) -> (i32, i32) {
    %c0_i32 = arith.constant 0 : i32
    %c0_i32_0 = arith.constant 0 : i32
    %c0_i32_1 = arith.constant 0 : i32
    return %c0_i32, %c0_i32_0 : i32, i32
  }
  func.func @transform_2(%arg0: i32) -> (i32, i32) {
    %c0_i32 = arith.constant 0 : i32
    %c0_i32_0 = arith.constant 0 : i32
    %c0_i32_1 = arith.constant 0 : i32
    return %c0_i32, %c0_i32_0 : i32, i32
  }
  func.func @transform_3(%arg0: i32) -> (i32, i32) {
    %c0_i32 = arith.constant 0 : i32
    %c0_i32_0 = arith.constant 0 : i32
    return %arg0, %c0_i32 : i32, i32
  }
}

</mosaic_0001>

<bundles_post_ra>
// kernel: _lambda_.1
= control target key start
LH: loop header
LB: loop body
LE: loop exit
PB: predicated region body
PF: predicated region fallthrough
CT: control target
= control target key end

     0   :  { %s1261_s0 = inlined_call_operand.vmem [shape: bf16[16,1024], index: 0, kind: input, shape index: {}]   ;;  %s1262_s1 = inlined_call_operand.vmem [shape: bf16[1024,32], index: 1, kind: input, shape index: {}]   ;;  %s1263_s2 = inlined_call_operand.vmem [shape: f32[1,32], index: 2, kind: input, shape index: {}]   ;;  %s1264_s3 = inlined_call_operand.hbm [shape: f32[16,32], index: 3, kind: output, shape index: {}]  }
   0x1   :  { %v930_v0 = vld [vmem:[%s1262_s1 + $0x78] sm:$0xff]   ;;  %v934_v4 = vld [vmem:[%s1262_s1 + $0x70] sm:$0xff]   ;;  %v938_v8 = vld [vmem:[%s1262_s1 + $0x68] sm:$0xff]  }
   0x2   :  { %v931_v1 = vld [vmem:[%s1262_s1 + $0xf8] sm:$0xff]   ;;  %839 = vmatprep.subr.bf16.mxu0 %v930_v0  ;;  %v935_v5 = vld [vmem:[%s1262_s1 + $0xf0] sm:$0xff]   ;;  %v939_v9 = vld [vmem:[%s1262_s1 + $0xe8] sm:$0xff]  }
   0x3   :  { %v932_v2 = vld [vmem:[%s1262_s1 + $0x38] sm:$0xff]   ;;  %861 = vmatprep.subr.bf16.mxu1 %v931_v1  ;;  %v936_v6 = vld [vmem:[%s1262_s1 + $0x30] sm:$0xff]   ;;  %v940_v10 = vld [vmem:[%s1262_s1 + $0x28] sm:$0xff]  }
   0x4   :  { %v933_v3 = vld [vmem:[%s1262_s1 + $0xb8] sm:$0xff]   ;;  %840 = vmatpush3.bf16.msra.mxu0 %v932_v2  ;;  %v937_v7 = vld [vmem:[%s1262_s1 + $0xb0] sm:$0xff]   ;;  %v941_v11 = vld [vmem:[%s1262_s1 + $0xa8] sm:$0xff]  }
   0x5   :  { %862 = vmatpush3.bf16.msra.mxu1 %v933_v3  ;;  %841 = vmatprep.subr.bf16.mxu0 %v934_v4  ;;  %v942_v12 = vld [vmem:[%s1262_s1 + $0x60] sm:$0xff]   ;;  %v946_v16 = vld [vmem:[%s1262_s1 + $0x58] sm:$0xff]   ;;  %v950_v20 = vld [vmem:[%s1262_s1 + $0x50] sm:$0xff]  }
   0x6   :  { %863 = vmatprep.subr.bf16.mxu1 %v935_v5  ;;  %v943_v13 = vld [vmem:[%s1262_s1 + $0xe0] sm:$0xff]   ;;  %v947_v17 = vld [vmem:[%s1262_s1 + $0xd8] sm:$0xff]   ;;  %v951_v21 = vld [vmem:[%s1262_s1 + $0xd0] sm:$0xff]  }
   0x7   :  { %v944_v14 = vld [vmem:[%s1262_s1 + $0x20] sm:$0xff]   ;;  %v948_v18 = vld [vmem:[%s1262_s1 + $0x18] sm:$0xff]   ;;  %v952_v22 = vld [vmem:[%s1262_s1 + $0x10] sm:$0xff]  }
   0x8   :  { %842 = vmatpush3.bf16.msra.mxu0 %v936_v6  ;;  %v945_v15 = vld [vmem:[%s1262_s1 + $0xa0] sm:$0xff]   ;;  %v949_v19 = vld [vmem:[%s1262_s1 + $0x98] sm:$0xff]   ;;  %v953_v23 = vld [vmem:[%s1262_s1 + $0x90] sm:$0xff]  }
   0x9   :  { %864 = vmatpush3.bf16.msra.mxu1 %v937_v7  ;;  %843 = vmatprep.subr.bf16.mxu0 %v938_v8  ;;  %v954_v24 = vld [vmem:[%s1262_s1 + $0x48] sm:$0xff]   ;;  %v958_v28 = vld [vmem:[%s1262_s1 + $0x40] sm:$0xff]   ;;  %v962_v40 = vld [vmem:[%s1262_s1 + $0x178] sm:$0xff]  }
   0xa   :  { %865 = vmatprep.subr.bf16.mxu1 %v939_v9  ;;  %v955_v25 = vld [vmem:[%s1262_s1 + $0xc8] sm:$0xff]   ;;  %v959_v29 = vld [vmem:[%s1262_s1 + $0xc0] sm:$0xff]   ;;  %v963_v41 = vld [vmem:[%s1262_s1 + $0x1f8] sm:$0xff]  }
   0xb   :  { %v956_v26 = vld [vmem:[%s1262_s1 + $0x8] sm:$0xff]   ;;  %v960_v30 = vld [vmem:[%s1262_s1] sm:$0xff]   ;;  %v964_v42 = vld [vmem:[%s1262_s1 + $0x138] sm:$0xff]  }
   0xc   :  { %844 = vmatpush3.bf16.msra.mxu0 %v940_v10  ;;  %v957_v27 = vld [vmem:[%s1262_s1 + $0x88] sm:$0xff]   ;;  %v961_v31 = vld [vmem:[%s1262_s1 + $0x80] sm:$0xff]   ;;  %v965_v43 = vld [vmem:[%s1262_s1 + $0x1b8] sm:$0xff]  }
   0xd   :  { %866 = vmatpush3.bf16.msra.mxu1 %v941_v11  ;;  %845 = vmatprep.subr.bf16.mxu0 %v942_v12  ;;  %v16_v32 = vld [vmem:[%s1261_s0] sm:$0xff]  ;;  %v17_v34 = vld [vmem:[%s1261_s0 + $0x8] sm:$0xff]  ;;  %v966_v44 = vld [vmem:[%s1262_s1 + $0x170] sm:$0xff]  }
   0xe   :  { %867 = vmatprep.subr.bf16.mxu1 %v943_v13  ;;  %v20_v33 = vld [vmem:[%s1261_s0 + $0x20] sm:$0xff]  ;;  %v21_v37 = vld [vmem:[%s1261_s0 + $0x28] sm:$0xff]  ;;  %v967_v45 = vld [vmem:[%s1262_s1 + $0x1f0] sm:$0xff]  }
   0xf   :  { %v767_v35 = vcombine.low %v16_v32, %v20_v33  ;;  %v768_v36 = vcombine.high %v16_v32, %v20_v33  ;;  %v769_v38 = vcombine.low %v17_v34, %v21_v37  ;;  %v770_v39 = vcombine.high %v17_v34, %v21_v37  ;;  %v968_v46 = vld [vmem:[%s1262_s1 + $0x130] sm:$0xff]   ;;  %v970_v48 = vld [vmem:[%s1262_s1 + $0x168] sm:$0xff]   ;;  %v974_v52 = vld [vmem:[%s1262_s1 + $0x160] sm:$0xff]  }
  0x10   :  { %846 = vmatpush3.bf16.msra.mxu0 %v944_v14  ;;  %v969_v47 = vld [vmem:[%s1262_s1 + $0x1b0] sm:$0xff]   ;;  %v971_v49 = vld [vmem:[%s1262_s1 + $0x1e8] sm:$0xff]   ;;  %v975_v53 = vld [vmem:[%s1262_s1 + $0x1e0] sm:$0xff]  }
  0x11   :  { %868 = vmatpush3.bf16.msra.mxu1 %v945_v15  ;;  %847 = vmatprep.subr.bf16.mxu0 %v946_v16  ;;  %v972_v50 = vld [vmem:[%s1262_s1 + $0x128] sm:$0xff]   ;;  %v976_v54 = vld [vmem:[%s1262_s1 + $0x120] sm:$0xff]   ;;  %v978_v56 = vld [vmem:[%s1262_s1 + $0x158] sm:$0xff]  }
  0x12   :  { %869 = vmatprep.subr.bf16.mxu1 %v947_v17  ;;  %615 = vmatprep.mubr.bf16.mxu0 %v768_v36  ;;  %v973_v51 = vld [vmem:[%s1262_s1 + $0x1a8] sm:$0xff]   ;;  %v977_v55 = vld [vmem:[%s1262_s1 + $0x1a0] sm:$0xff]   ;;  %v979_v57 = vld [vmem:[%s1262_s1 + $0x1d8] sm:$0xff]  }
  0x13   :  { %656 = vmatprep.mubr.bf16.mxu1 %v770_v39  ;;  %v980_v58 = vld [vmem:[%s1262_s1 + $0x118] sm:$0xff]   ;;  %v982_v60 = vld [vmem:[%s1262_s1 + $0x150] sm:$0xff]   ;;  %v986_v0 = vld [vmem:[%s1262_s1 + $0x148] sm:$0xff]  }
  0x14   :  { %848 = vmatpush3.bf16.msra.mxu0 %v948_v18  ;;  %v981_v59 = vld [vmem:[%s1262_s1 + $0x198] sm:$0xff]   ;;  %v983_v61 = vld [vmem:[%s1262_s1 + $0x1d0] sm:$0xff]   ;;  %v987_v1 = vld [vmem:[%s1262_s1 + $0x1c8] sm:$0xff]  }
  0x15   :  { %870 = vmatpush3.bf16.msra.mxu1 %v949_v19  ;;  %849 = vmatprep.subr.bf16.mxu0 %v950_v20  ;;  %v984_v62 = vld [vmem:[%s1262_s1 + $0x110] sm:$0xff]   ;;  %v988_v2 = vld [vmem:[%s1262_s1 + $0x108] sm:$0xff]   ;;  %v990_v4 = vld [vmem:[%s1262_s1 + $0x140] sm:$0xff]  }
  0x16   :  { %871 = vmatprep.subr.bf16.mxu1 %v951_v21  ;;  %v985_v63 = vld [vmem:[%s1262_s1 + $0x190] sm:$0xff]   ;;  %v989_v3 = vld [vmem:[%s1262_s1 + $0x188] sm:$0xff]   ;;  %v991_v5 = vld [vmem:[%s1262_s1 + $0x1c0] sm:$0xff]  }
  0x17   :  { %v992_v6 = vld [vmem:[%s1262_s1 + $0x100] sm:$0xff]   ;;  %v18_v8 = vld [vmem:[%s1261_s0 + $0x10] sm:$0xff]  ;;  %v19_v12 = vld [vmem:[%s1261_s0 + $0x18] sm:$0xff] }
  0x18   :  { %850 = vmatpush3.bf16.msra.mxu0 %v952_v22  ;;  %v993_v7 = vld [vmem:[%s1262_s1 + $0x180] sm:$0xff]   ;;  %v22_v9 = vld [vmem:[%s1261_s0 + $0x30] sm:$0xff]  ;;  %v23_v13 = vld [vmem:[%s1261_s0 + $0x38] sm:$0xff] }
  0x19   :  { %872 = vmatpush3.bf16.msra.mxu1 %v953_v23  ;;  %851 = vmatprep.subr.bf16.mxu0 %v954_v24  ;;  %v771_v10 = vcombine.low %v18_v8, %v22_v9  ;;  %v772_v11 = vcombine.high %v18_v8, %v22_v9 }
  0x1a   :  { %873 = vmatprep.subr.bf16.mxu1 %v955_v25 }
  0x1c   :  { %852 = vmatpush3.bf16.msra.mxu0 %v956_v26 }
  0x1d   :  { %874 = vmatpush3.bf16.msra.mxu1 %v957_v27  ;;  %853 = vmatprep.subr.bf16.mxu0 %v958_v28 }
  0x1e   :  { %875 = vmatprep.subr.bf16.mxu1 %v959_v29 }
  0x20   :  { %854 = vmatpush3.bf16.msra.mxu0 %v960_v30 }
  0x21   :  { %876 = vmatpush3.bf16.msra.mxu1 %v961_v31  ;;  %883 = vmatprep.subr.bf16.mxu0 %v962_v40 }
  0x22   :  { %905 = vmatprep.subr.bf16.mxu1 %v963_v41 }
  0x23   :  { %616 = vmatmul.mubr.bf16.vlgmr.msra.gmra.mxu0 %v767_v35 }
  0x24   :  { %657 = vmatmul.mubr.bf16.vlgmr.msra.gmra.mxu1 %v769_v38  ;;  %884 = vmatpush3.bf16.msra.mxu0 %v964_v42 }
  0x25   :  { %906 = vmatpush3.bf16.msra.mxu1 %v965_v43  ;;  %885 = vmatprep.subr.bf16.mxu0 %v966_v44 }
  0x26   :  { %907 = vmatprep.subr.bf16.mxu1 %v967_v45 }
  0x28   :  { %886 = vmatpush3.bf16.msra.mxu0 %v968_v46 }
  0x29   :  { %908 = vmatpush3.bf16.msra.mxu1 %v969_v47  ;;  %887 = vmatprep.subr.bf16.mxu0 %v970_v48 }
  0x2a   :  { %909 = vmatprep.subr.bf16.mxu1 %v971_v49 }
  0x2c   :  { %888 = vmatpush3.bf16.msra.mxu0 %v972_v50 }
  0x2d   :  { %910 = vmatpush3.bf16.msra.mxu1 %v973_v51  ;;  %889 = vmatprep.subr.bf16.mxu0 %v974_v52 }
  0x2e   :  { %911 = vmatprep.subr.bf16.mxu1 %v975_v53 }
  0x30   :  { %890 = vmatpush3.bf16.msra.mxu0 %v976_v54 }
  0x31   :  { %912 = vmatpush3.bf16.msra.mxu1 %v977_v55  ;;  %891 = vmatprep.subr.bf16.mxu0 %v978_v56 }
  0x32   :  { %913 = vmatprep.subr.bf16.mxu1 %v979_v57 }
  0x34   :  { %892 = vmatpush3.bf16.msra.mxu0 %v980_v58 }
  0x35   :  { %914 = vmatpush3.bf16.msra.mxu1 %v981_v59  ;;  %893 = vmatprep.subr.bf16.mxu0 %v982_v60 }
  0x36   :  { %915 = vmatprep.subr.bf16.mxu1 %v983_v61 }
  0x38   :  { %894 = vmatpush3.bf16.msra.mxu0 %v984_v62 }
  0x39   :  { %916 = vmatpush3.bf16.msra.mxu1 %v985_v63  ;;  %895 = vmatprep.subr.bf16.mxu0 %v986_v0 }
  0x3a   :  { %917 = vmatprep.subr.bf16.mxu1 %v987_v1 }
  0x3c   :  { %896 = vmatpush3.bf16.msra.mxu0 %v988_v2 }
  0x3d   :  { %918 = vmatpush3.bf16.msra.mxu1 %v989_v3  ;;  %897 = vmatprep.subr.bf16.mxu0 %v990_v4 }
  0x3e   :  { %919 = vmatprep.subr.bf16.mxu1 %v991_v5 }
  0x40   :  { %898 = vmatpush3.bf16.msra.mxu0 %v992_v6 }
  0x41   :  { %8 = vsyncpa [#allocation3], 0  ;;  %920 = vmatpush3.bf16.msra.mxu1 %v993_v7  ;;  %v773_v14 = vcombine.low %v19_v12, %v23_v13  ;;  %v774_v15 = vcombine.high %v19_v12, %v23_v13  ;;  %697 = vmatprep.mubr.bf16.mxu0 %v772_v11  ;;  %v766_v23 = vld [vmem:[%s1263_s2] ss:$0 sm:$0xff]  ;;  %vm747_vm0 = vcmask 261120   ;;  %s1016_s0 = smov [#allocation2]  }
  0x42   :  { %s755_s2 = sshll.u32 %s1016_s0, 4  ;;  %s756_s2 = int_to_ptr.vmem [resolvable:$true] %s755_s2 }
  0x43   :  { %738 = vmatprep.mubr.bf16.mxu1 %v774_v15  ;;  %698 = vmatmul.mubr.bf16.vlgmr.msra.gmra.mxu0 %v771_v10  ;;  %s994_s22 = scalar_lea.vmem %s756_s2, 256  ;;  %p999_p1 = scmp.lt.s32.totalorder %s756_s2, %s756_s2 }
  0x44   :  { %739 = vmatmul.mubr.bf16.vlgmr.msra.gmra.mxu1 %v773_v14  ;;  %p995_p0 = scmp.ne.s32.totalorder %s756_s2, %s994_s22  ;;  %p1000_p2 = scmp.lt.s32.totalorder %s994_s22, %s994_s22 }
  0x46   :  { %p1001_p3 = por %p1000_p2, %p999_p1 }
  0x48   :  { %p1002_p4 = pnand %p1001_p3, %p995_p0 }
  0xe3   :  { %v855_v16 = vpop.f32.mrf.mxu0 }
  0xe4   :  { %v877_v17 = vpop.f32.mrf.mxu1 }
  0xe5   :  { %v856_v18 = vpop.f32.mrf.mxu0 }
  0xe6   :  { %v878_v19 = vpop.f32.mrf.mxu1  ;;  %v857_v21 = vadd.f32 %v856_v18, %v855_v16 }
  0xe7   :  { %v858_v20 = vpop.f32.mrf.mxu0  ;;  %v879_v26 = vadd.f32 %v878_v19, %v877_v17 }
  0xe8   :  { %v880_v22 = vpop.f32.mrf.mxu1  ;;  %v618_v25 = vadd.f32 %v857_v21, %v766_v23 }
  0xe9   :  { %v859_v24 = vpop.f32.mrf.mxu0 }
  0xea   :  { %v860_v27 = vadd.f32 %v859_v24, %v858_v20  ;;  %v881_v28 = vpop.f32.mrf.mxu1  ;;  %v659_v32 = vadd.f32 %v879_v26, %v618_v25 }
  0xeb   :  { %v882_v37 = vadd.f32 %v881_v28, %v880_v22 }
  0xec   :  { %v621_v33 = vadd.f32 %v860_v27, %v766_v23 }
  0xee   :  { %v662_v42 = vadd.f32 %v882_v37, %v621_v33 }
 0x103   :  { %v899_v29 = vpop.f32.mrf.mxu0 }
 0x104   :  { %v921_v30 = vpop.f32.mrf.mxu1 }
 0x105   :  { %v900_v31 = vpop.f32.mrf.mxu0 }
 0x106   :  { %v901_v34 = vadd.f32 %v900_v31, %v899_v29  ;;  %v922_v35 = vpop.f32.mrf.mxu1 }
 0x107   :  { %v902_v36 = vpop.f32.mrf.mxu0  ;;  %v923_v39 = vadd.f32 %v922_v35, %v921_v30 }
 0x108   :  { %v700_v38 = vadd.f32 %v901_v34, %v659_v32  ;;  %v924_v40 = vpop.f32.mrf.mxu1 }
 0x109   :  { %v903_v41 = vpop.f32.mrf.mxu0 }
 0x10a   :  { %v741_v43 = vadd.f32 %v923_v39, %v700_v38  ;;  %v904_v44 = vadd.f32 %v903_v41, %v902_v36  ;;  %v925_v45 = vpop.f32.mrf.mxu1 }
 0x10b   :  { %v926_v47 = vadd.f32 %v925_v45, %v924_v40 }
 0x10c   :  { %748 = vst.msk [vmem:[#allocation2] sm:$0xff] %vm747_vm0, %v741_v43  ;;  %v703_v46 = vadd.f32 %v904_v44, %v662_v42 }
 0x10e   :  { %v744_v48 = vadd.f32 %v926_v47, %v703_v46 }
 0x110   :  { %749 = vst.msk [vmem:[#allocation2 + $0x8] sm:$0xff] %vm747_vm0, %v744_v48 }
 0x111   :  { %1005 = shalt.err (!%p1002_p4)
}
 0x112   :  { %s1017_s23 = smov 128   ;;  %s1018_s24 = smov 8  }
 0x113   :  { %761 = dma.vmem_to_hbm [thread:$0]  %s756_s2, 256, %s1264_s3, [#allocation3], %s1017_s23, %s1017_s23, %s1018_s24  }
 0x114   :  { %1014 = dma.done.wait [#allocation3], 256  }
 0x115   :  { %1015 = vsyncadd [#allocation3], 4294967040 }
 0x116   :  { %765 = vsyncpa [#allocation3], 1 }

</bundles_post_ra>
